<compile_context>
chip_gen: v5e
topology: v5e:2x2
jax: 0.10.0
libtpu: 0.0.40
codegen_flags: <defaults>
</compile_context>

<pallas_src>
import functools

import jax
import jax.numpy as jnp
from jax.experimental import pallas as pl
from jax.experimental.pallas import tpu as pltpu

BLOCK_SIZE = 16  # matches `block_size` in the PyTorch module (max T)

# TODO(synk): only the attention `Head` hot path is implemented as a Pallas
# kernel; embeddings / LayerNorm / FeedForward / final projection of the full
# LLM are plain JAX outside this kernel's scope.
# TODO(synk): Dropout(p=0.2) is treated as identity (eval mode); training-mode
# dropout would use pltpu.prng_seed / pltpu.stateful_bernoulli.


def head_kernel(x_ref, wqkv_ref, o_ref):
    # x_ref    : (Bb, T, C)
    # wqkv_ref : (C, 3H)   (wq | wk | wv concatenated on the output dim)
    # o_ref    : (Bb, T*H) (lane-dense output block; T*H is a multiple of 128)
    Bb, T, C = x_ref.shape
    H = wqkv_ref.shape[1] // 3

    # Fused QKV projection: one (Bb*T, C) @ (C, 3H) MXU matmul.
    x2d = x_ref[...].reshape(Bb * T, C)                       # (Bb*T, C)
    qkv = jnp.dot(x2d, wqkv_ref[...],
                  preferred_element_type=jnp.float32)         # (Bb*T, 3H)
    qkv = qkv.reshape(Bb, T, 3 * H)
    q = qkv[:, :, 0:H]                                        # (Bb, T, H)
    k = qkv[:, :, H:2 * H]
    v = qkv[:, :, 2 * H:3 * H]

    # Attention scores: contract on the last axis of both operands (no .T).
    # No 1/sqrt(H) scaling -- faithful to the reference module.
    w = jnp.einsum('bth,bsh->bts', q, k,
                   preferred_element_type=jnp.float32)        # (Bb, T, T)

    # Causal mask (tril). Finite sentinel keeps padded rows NaN-free.
    row = jax.lax.broadcasted_iota(jnp.int32, (Bb, T, T), 1)
    col = jax.lax.broadcasted_iota(jnp.int32, (Bb, T, T), 2)
    w = jnp.where(row >= col, w, -1e30)

    # Softmax along the last dim. Diagonal is always unmasked -> denom >= 1,
    # so the approximate (EUP) reciprocal is numerically safe here.
    w_max = jnp.max(w, axis=-1, keepdims=True)
    e = jnp.exp(w - w_max)
    denom = jnp.sum(e, axis=-1, keepdims=True)
    p = e * pl.reciprocal(denom, approx=True)                 # (Bb, T, T)

    out = jnp.einsum('bts,bsh->bth', p, v,
                     preferred_element_type=jnp.float32)      # (Bb, T, H)

    # Lane-dense store: one (Bb, T*H) block, T*H multiple of 128.
    o_ref[...] = out.reshape(Bb, T * H).astype(o_ref.dtype)


@functools.partial(jax.jit, static_argnames=("block_b",))
def head_forward(x, wq, wk, wv, *, block_b=16):
    """x: (B, T, C) f32; wq/wk/wv: (C, H) f32. Returns (B, T, H)."""
    B, T, C = x.shape
    H = wq.shape[1]
    assert T <= BLOCK_SIZE
    assert (T * H) % 128 == 0, "T*H must be a multiple of 128 for the lane-dense output"

    Bb = min(block_b, B)
    assert B % Bb == 0, "batch must be divisible by the per-step block"

    # Fuse the three projection weights into one (C, 3H) matrix.
    wqkv = jnp.concatenate([wq, wk, wv], axis=1)

    out_flat = pl.pallas_call(
        head_kernel,
        out_shape=jax.ShapeDtypeStruct((B, T * H), x.dtype),
        grid_spec=pltpu.PrefetchScalarGridSpec(
            num_scalar_prefetch=0,
            grid=(B // Bb,),
            in_specs=[
                pl.BlockSpec((Bb, T, C), lambda b: (b, 0, 0)),
                pl.BlockSpec((C, 3 * H), lambda b: (0, 0)),
            ],
            out_specs=pl.BlockSpec((Bb, T * H), lambda b: (b, 0)),
        ),
        compiler_params=pltpu.CompilerParams(
            dimension_semantics=("parallel",)),
    )(x, wqkv)

    return out_flat.reshape(B, T, H)


def head_reference(x, wq, wk, wv):
    """Pure-JAX reference for correctness checking (matches PyTorch Head)."""
    q = x @ wq
    k = x @ wk
    v = x @ wv
    w = q @ jnp.swapaxes(k, -1, -2)
    T = x.shape[1]
    tril = jnp.tril(jnp.ones((T, T), dtype=bool))
    w = jnp.where(tril, w, -jnp.inf)
    w = jax.nn.softmax(w, axis=-1)
    return w @ v


if __name__ == "__main__":
    # Small shapes consistent with the module: T=8 (<= block_size=16),
    # n_embed=32, head_size=16.  B=32 with Bb=16 gives 128-row projection
    # matmuls per grid step and 2 parallel grid steps (both v7x TCs busy).
    B, T, C, H = 32, 8, 32, 16

    key = jax.random.PRNGKey(0)
    kx, kq, kk, kv = jax.random.split(key, 4)
    x = jax.random.normal(kx, (B, T, C), dtype=jnp.float32)
    # Deterministic "Linear(n_embed, head_size, bias=False)" weights,
    # stored as (C, H) == transpose of the PyTorch (H, C) weight.
    wq = jax.random.normal(kq, (C, H), dtype=jnp.float32) * 0.1
    wk = jax.random.normal(kk, (C, H), dtype=jnp.float32) * 0.1
    wv = jax.random.normal(kv, (C, H), dtype=jnp.float32) * 0.1

    out = head_forward(x, wq, wk, wv, block_b=16)
    out = jax.block_until_ready(out)

    ref = head_reference(x, wq, wk, wv)
    assert out.shape == (B, T, H)
    # Tolerance accommodates the approximate (EUP) reciprocal in the softmax.
    assert jnp.allclose(out, ref, atol=1e-2, rtol=1e-2), float(
        jnp.max(jnp.abs(out - ref)))

    print("KERNEL_OK")
</pallas_src>

<mosaic_0001>
module attributes {stable_mosaic.version = 11 : i64} {
  func.func @head_kernel(%arg0: i32, %arg1: memref<16x8x32xf32, #tpu.memory_space<vmem>>, %arg2: memref<32x48xf32, #tpu.memory_space<vmem>>, %arg3: memref<16x128xf32, #tpu.memory_space<vmem>>) attributes {dimension_semantics = [#tpu.dimension_semantics<parallel>], iteration_bounds = array<i64: 2>, scalar_prefetch = 0 : i64, scratch_operands = 0 : i64, tpu.core_type = #tpu.core_type<tc>, window_params = [{transform_indices = @transform_0, window_bounds = array<i64: 16, 8, 32>}, {pipeline_mode = #tpu.pipeline_mode<synchronous>, transform_indices = @transform_1, window_bounds = array<i64: 32, 48>}, {transform_indices = @transform_2, window_bounds = array<i64: 16, 128>}]} {
    %c0 = arith.constant 0 : index
    %c0_0 = arith.constant 0 : index
    %c0_1 = arith.constant 0 : index
    %0 = vector.load %arg1[%c0, %c0_0, %c0_1] : memref<16x8x32xf32, #tpu.memory_space<vmem>>, vector<16x8x32xf32>
    %1 = vector.shape_cast %0 : vector<16x8x32xf32> to vector<128x32xf32>
    %c0_2 = arith.constant 0 : index
    %c0_3 = arith.constant 0 : index
    %2 = vector.load %arg2[%c0_2, %c0_3] : memref<32x48xf32, #tpu.memory_space<vmem>>, vector<32x48xf32>
    %cst = arith.constant dense<0.000000e+00> : vector<128x48xf32>
    %3 = tpu.matmul %1, %2, %cst {dimension_numbers = #tpu.dot_dimension_numbers<[1], [0], [0], [1], [0, 0, 1, 1], [], []>} : vector<128x32xf32>, vector<32x48xf32>, vector<128x48xf32> -> vector<128x48xf32>
    %4 = vector.shape_cast %3 : vector<128x48xf32> to vector<16x8x48xf32>
    %5 = vector.extract_strided_slice %4 {offsets = [0, 0, 0], sizes = [16, 8, 16], strides = [1, 1, 1]} : vector<16x8x48xf32> to vector<16x8x16xf32>
    %6 = vector.extract_strided_slice %4 {offsets = [0, 0, 16], sizes = [16, 8, 16], strides = [1, 1, 1]} : vector<16x8x48xf32> to vector<16x8x16xf32>
    %7 = vector.extract_strided_slice %4 {offsets = [0, 0, 32], sizes = [16, 8, 16], strides = [1, 1, 1]} : vector<16x8x48xf32> to vector<16x8x16xf32>
    "tpu.trace_start"() <{level = 10 : i32, message = "bth,bsh->bts"}> : () -> ()
    %cst_4 = arith.constant dense<0.000000e+00> : vector<16x8x8xf32>
    %8 = tpu.matmul %5, %6, %cst_4 {dimension_numbers = #tpu.dot_dimension_numbers<[2], [2], [1], [1], [0, 0, 0, 1, 1, 1], [0], [0]>} : vector<16x8x16xf32>, vector<16x8x16xf32>, vector<16x8x8xf32> -> vector<16x8x8xf32>
    "tpu.trace_stop"() : () -> ()
    %9 = tpu.iota {dimensions = array<i32: 1>} : vector<16x8x8xi32>
    %10 = tpu.iota {dimensions = array<i32: 2>} : vector<16x8x8xi32>
    %11 = arith.cmpi sge, %9, %10 : vector<16x8x8xi32>
    %cst_5 = arith.constant -1.000000e+30 : f32
    %12 = vector.broadcast %cst_5 : f32 to vector<16x8x8xf32>
    %13 = arith.select %11, %8, %12 : vector<16x8x8xi1>, vector<16x8x8xf32>
    %cst_6 = arith.constant dense<0xFF800000> : vector<16x8xf32>
    %14 = vector.multi_reduction <maximumf>, %13, %cst_6 [2] : vector<16x8x8xf32> to vector<16x8xf32>
    %15 = vector.shape_cast %14 : vector<16x8xf32> to vector<16x8x1xf32>
    %16 = vector.broadcast %15 : vector<16x8x1xf32> to vector<16x8x8xf32>
    %17 = arith.subf %13, %16 : vector<16x8x8xf32>
    %18 = math.exp %17 : vector<16x8x8xf32>
    %cst_7 = arith.constant dense<0.000000e+00> : vector<16x8xf32>
    %19 = vector.multi_reduction <add>, %18, %cst_7 [2] : vector<16x8x8xf32> to vector<16x8xf32>
    %20 = vector.shape_cast %19 : vector<16x8xf32> to vector<16x8x1xf32>
    %21 = tpu.reciprocal %20 {approx = true} : vector<16x8x1xf32> -> vector<16x8x1xf32>
    %22 = vector.broadcast %21 : vector<16x8x1xf32> to vector<16x8x8xf32>
    %23 = arith.mulf %18, %22 : vector<16x8x8xf32>
    "tpu.trace_start"() <{level = 10 : i32, message = "bts,bsh->bth"}> : () -> ()
    %cst_8 = arith.constant dense<0.000000e+00> : vector<16x8x16xf32>
    %24 = tpu.matmul %23, %7, %cst_8 {dimension_numbers = #tpu.dot_dimension_numbers<[2], [1], [1], [2], [0, 0, 0, 1, 1, 2], [0], [0]>} : vector<16x8x8xf32>, vector<16x8x16xf32>, vector<16x8x16xf32> -> vector<16x8x16xf32>
    "tpu.trace_stop"() : () -> ()
    %25 = vector.shape_cast %24 : vector<16x8x16xf32> to vector<16x128xf32>
    %c0_9 = arith.constant 0 : index
    %c0_10 = arith.constant 0 : index
    %26 = vector.load %arg3[%c0_9, %c0_10] : memref<16x128xf32, #tpu.memory_space<vmem>>, vector<16x128xf32>
    tpu.vector_store %arg3[%c0_9, %c0_10], %25 {strides = array<i32>} : memref<16x128xf32, #tpu.memory_space<vmem>>, vector<16x128xf32>,
    return
  }
  func.func @transform_0(%arg0: i32) -> (i32, i32, i32) {
    %c0_i32 = arith.constant 0 : i32
    %c0_i32_0 = arith.constant 0 : i32
    %c0_i32_1 = arith.constant 0 : i32
    return %arg0, %c0_i32, %c0_i32_0 : i32, i32, i32
  }
  func.func @transform_1(%arg0: i32) -> (i32, i32) {
    %c0_i32 = arith.constant 0 : i32
    %c0_i32_0 = arith.constant 0 : i32
    %c0_i32_1 = arith.constant 0 : i32
    return %c0_i32, %c0_i32_0 : i32, i32
  }
  func.func @transform_2(%arg0: i32) -> (i32, i32) {
    %c0_i32 = arith.constant 0 : i32
    %c0_i32_0 = arith.constant 0 : i32
    return %arg0, %c0_i32 : i32, i32
  }
}

</mosaic_0001>

<bundles_post_ra>
// kernel: head_forward.1
= control target key start
LH: loop header
LB: loop body
LE: loop exit
PB: predicated region body
PF: predicated region fallthrough
CT: control target
= control target key end

     0   :  { %7 = vsyncpa [#allocation3], 0  ;;  %s2621_s0 = inlined_call_operand.hbm [shape: f32[32,8,32], index: 0, kind: input, shape index: {}]   ;;  %s2622_s1 = inlined_call_operand.vmem [shape: f32[32,48], index: 1, kind: input, shape index: {}]   ;;  %s2623_s2 = inlined_call_operand.vmem [shape: f32[32,128], index: 2, kind: output, shape index: {}]  }
   0x1   :  { %9 = vsyncpa [#allocation3 + $0x1], 0  ;;  %s2049_s9 = smov 0   ;;  %s2051_s10 = smov 0  }
   0x2   :  { %s2053_s11 = smov 0   ;;  %s2055_s12 = smov 0  }
   0x3 LB: > { %s1718_s13 = sadd.s32 4294967295, %s2021_s12   ;;  %s2069_s14 = sadd.s32 1, %s2021_s12   ;;  %s2021_s12 = sphi %s2055_s12, %s2632_s12   ;;  %s2017_s11 = sphi %s2053_s11, %s2631_s11   ;;  %s2013_s10 = sphi %s2051_s10, %s2630_s10   ;;  %s2009_s9 = sphi %s2049_s9, %s2629_s9  }
   0x4   : > { %s19_s15 = ssub.s32 %s2021_s12, %s2069_s14  ;;  %s22_s16 = sadd.s32 1, %s2017_s11 }
   0x5   : > { %p20_p0 = scmp.eq.s32.totalorder %s19_s15, 0  ;;  %p29_p1 = scmp.ne.s32.totalorder %s2017_s11, %s2013_s10 }
   0x6   : > { %p30_p2 = scmp.eq.s32.totalorder %s2021_s12, 0  ;;  %p35_p3 = scmp.ne.s32.totalorder %s2013_s10, %s2009_s9 }
   0x7   : > { %s2079_s17 = scalar_select %p20_p0, %s2017_s11, %s22_s16  }
   0x8   : > { %p2081_p4 = por %p30_p2, %p29_p1  ;;  %p36_p5 = scmp.eq.s32.totalorder %s1718_s13, 0 }
   0x9   : > { %p1814_p6 = scmp.lt.s32.totalorder %s2021_s12, 2  ;;  %s109_s20 = sand.u32 1, %s2017_s11  }
   0xa   : > { %p2088_p7 = por %p36_p5, %p35_p3  ;;  %s1722_s21 = sshll.u32 %s109_s20, 7 }
   0xb   : > { %s1795_s22 = sshll.u32 %s2021_s12, 7  ;;  %s113_s26 = scalar_lea.vmem [#allocation2], %s1722_s21 }
   0xc   : > { %s118_s25 = scalar_lea.hbm %s2621_s0, %s1795_s22  ;;  %s121_s27 = sshll.u32 %s113_s26, 4  ;;  %s122_s27 = int_to_ptr.vmem [resolvable:$true] %s121_s27 }
   0xd   : > { %s119_s28 = sshll.u32 %s118_s25, 4  ;;  %p2099_p8 = pnand %p1814_p6, %p2081_p4  ;;  %s120_s28 = int_to_ptr.hbm [resolvable:$true] %s119_s28 }
   0xe   : > { %p1725_p9 = scmp.ge.s32.totalorder %s2021_s12, 1  ;;  %s110_s30 = scalar_lea.sflag [#allocation3], %s109_s20 }
   0xf   : > { %s1957_s3 = sshra.s32 %s120_s28, 4  ;;  %p1961_p11 = pneg %p2099_p8  ;;  %s1958_s3 = int_to_ptr.hbm [resolvable:$true] %s1957_s3 }
  0x10   : > { %s1959_s4 = scalar_lea.hbm %s1958_s3, 128  ;;  %s1964_s7 = scalar_lea.hbm %s2621_s0, 256 }
  0x11   : > { %p1960_p10 = scmp.ne.s32.totalorder %s1958_s3, %s1959_s4  ;;  %p1965_p0 = scmp.lt.s32.totalorder %s1958_s3, %s2621_s0 }
  0x12   : > { %p1966_p1 = scmp.lt.s32.totalorder %s1964_s7, %s1959_s4 }
  0x13   : > { %p1962_p12 = pnand %p1961_p11, %p1960_p10 }
  0x14   : > { %p1967_p2 = por %p1966_p1, %p1965_p0 }
  0x15   : > { %p1963_p13 = pneg %p1962_p12 }
  0x17   : > { %p1968_p3 = pnand %p1967_p2, %p1963_p13 }
  0x19   : > { %1971 = shalt.err (!%p1968_p3)
}
  0x1a   : > { %s2023_s15 = smov 128   ;;  %s2024_s16 = smov 8  }
  0x1b   : > { %1813 = dma.hbm_to_vmem [thread:$0]  (!%p2099_p8), %s120_s28, 2048, %s122_s27, %s110_s30, %s2023_s15, %s2023_s15, %s2024_s16  }
  0x1c   : > { %p129_p4 = scmp.lt.s32.totalorder %s2021_s12, 3 }
  0x1e   : > { %p130_p5 = pnand %p1725_p9, %p129_p4 }
  0x1f   : > { %s135_s18 = sand.u32 (!%p130_p5), 1, %s2013_s10  }
  0x20   : > { %133 = sbr.rel (%p130_p5) target bundleno = 1099 (0x44b), region = 28  ;;  %s1726_s20 = sshll.u32 (!%p130_p5), %s135_s18, 7 }
  0x21   : > { %s136_s21 = scalar_lea.sflag (!%p130_p5), [#allocation3], %s135_s18  ;;  %s2118_s22 = scalar_lea.vmem (!%p130_p5), [#allocation2], %s1726_s20 }
  0x25   : > { %2004 = dma.done.wait (%p2088_p7), %s136_s21, 2048  }
  0x26   : > { %2006 = vsyncadd (%p2088_p7), %s136_s21, 4294965248  ;;  %v187_v0 = vld [vmem:[%s2622_s1 + $0x18] sm:$0xff]  ;;  %v186_v1 = vld [vmem:[%s2622_s1 + $0x10] sm:$0xff]  ;;  %vm188_vm0 = vcmask 261120   ;;  %s2025_s30 = smov 112   ;;  %s2026_s3 = smov 96  }
  0x27   : > { %249 = vmatpush.msra.mxu0 %v187_v0  ;;  %1798 = vmatpush.msra.mxu3 %v187_v0  ;;  %v185_v2 = vld [vmem:[%s2622_s1 + $0x8] sm:$0xff]  ;;  %v184_v3 = vld [vmem:[%s2622_s1] sm:$0xff]  ;;  %v170_v6 = vld [vmem:[%s2118_s22 + $0x10] sm:$0xff]  ;;  %vm305_vm1 = vcmask 130048   ;;  %vm756_vm3 = vcmask 64512   ;;  %vm1350_vm4 = vcmask 1047556  }
  0x28   : > { %1796 = vmatpush.msra.mxu1 %v187_v0  ;;  %1797 = vmatpush.msra.mxu2 %v187_v0  ;;  %v168_v4 = vld [vmem:[%s2118_s22] sm:$0xff]  ;;  %v169_v5 = vld [vmem:[%s2118_s22 + $0x8] sm:$0xff]  ;;  %v171_v7 = vld [vmem:[%s2118_s22 + $0x18] sm:$0xff]  ;;  %s2029_s4 = smov 80   ;;  %s2030_s5 = smov 48   ;;  %vm1634_vm5 = vcmask 392192  }
  0x29   : > { %250 = vmatpush.msra.mxu0 %v186_v1  ;;  %1801 = vmatpush.msra.mxu3 %v186_v1  ;;  %v172_v8 = vld [vmem:[%s2118_s22 + $0x20] sm:$0xff]  ;;  %v173_v9 = vld [vmem:[%s2118_s22 + $0x28] sm:$0xff]  ;;  %v182_v10 = vld [vmem:[%s2118_s22 + $0x70] sm:$0xff]  ;;  %s2031_s6 = smov 16   ;;  %s2032_s7 = smov 32   ;;  %vm1637_vm6 = vcmask 523264  }
  0x2a   : > { %1799 = vmatpush.msra.mxu1 %v186_v1  ;;  %1800 = vmatpush.msra.mxu2 %v186_v1  ;;  %v174_v11 = vld [vmem:[%s2118_s22 + $0x30] sm:$0xff]  ;;  %v180_v12 = vld [vmem:[%s2118_s22 + $0x60] sm:$0xff]  ;;  %v181_v13 = vld [vmem:[%s2118_s22 + $0x68] sm:$0xff]  ;;  %s2033_s8 = smov 64   ;;  %s1727_s9 = sshll.u32 %s1718_s13, 1  ;;  %vm1640_vm7 = vcmask 654336  }
  0x2b   : > { %251 = vmatpush.msra.mxu0 %v185_v2  ;;  %1804 = vmatpush.msra.mxu3 %v185_v2  ;;  %v183_v14 = vld [vmem:[%s2118_s22 + $0x78] sm:$0xff]  ;;  %v176_v16 = vld [vmem:[%s2118_s22 + $0x40] sm:$0xff]  ;;  %v177_v17 = vld [vmem:[%s2118_s22 + $0x48] sm:$0xff]  ;;  %p163_p6 = scmp.lt.s32.totalorder %s1727_s9, 3  ;;  %vm1643_vm8 = vcmask 785408   ;;  %vm1646_vm9 = vcmask 916480  }
  0x2c   : > { %1802 = vmatpush.msra.mxu1 %v185_v2  ;;  %1803 = vmatpush.msra.mxu2 %v185_v2  ;;  %v175_v15 = vld [vmem:[%s2118_s22 + $0x38] sm:$0xff]  ;;  %v178_v18 = vld [vmem:[%s2118_s22 + $0x50] sm:$0xff]  ;;  %v735_v2 = vlaneseq }
  0x2d   : > { %252 = vmatpush.msra.mxu0 %v184_v3  ;;  %1807 = vmatpush.msra.mxu3 %v184_v3  ;;  %v179_v19 = vld [vmem:[%s2118_s22 + $0x58] sm:$0xff]  ;;  %s2634_s9 = smov (!%p163_p6, %s1727_s9), 3 }
  0x2e   : > { %1729 = vmatmul.msk.f32.vlgmr.msra.gmra.mxu0 %vm188_vm0, %v168_v4  ;;  %1805 = vmatpush.msra.mxu1 %v184_v3  ;;  %v738_v4 = vand.u32 127, %v735_v2  ;;  %s1728_s15 = sshll.u32 %s2634_s9, 3 }
  0x2f   : > { %1806 = vmatpush.msra.mxu2 %v184_v3  ;;  %1743 = vmatmul.msk.f32.vlgmr.msra.gmra.mxu3 %vm188_vm0, %v182_v10  ;;  %v736_v3 = vshrl.u32 %v735_v2, 7  ;;  %s166_s16 = scalar_lea.vmem %s2623_s2, %s1728_s15 }
  0x30   : > { %1741 = vmatmul.msk.f32.vlgmr.msra.gmra.mxu1 %vm188_vm0, %v180_v12  ;;  %1742 = vmatmul.msk.f32.vlgmr.msra.gmra.mxu2 %vm188_vm0, %v181_v13 }
  0x31   : > { %vm2258_vm2 = vcmp.ge.s32.totalorder %v736_v3, %v738_v4 }
  0x36   : > { %1730 = vmatmul.msk.f32.gmra.mxu0 %vm188_vm0, %v169_v5 }
  0x37   : > { %1744 = vmatmul.msk.f32.gmra.mxu3 %vm188_vm0, %v183_v14 }
  0x3e   : > { %1731 = vmatmul.msk.f32.gmra.mxu0 %vm188_vm0, %v170_v6 }
  0x46   : > { %1732 = vmatmul.msk.f32.gmra.mxu0 %vm188_vm0, %v171_v7 }
  0x4e   : > { %1733 = vmatmul.msk.f32.gmra.mxu0 %vm188_vm0, %v172_v8 }
  0x56   : > { %1734 = vmatmul.msk.f32.gmra.mxu0 %vm188_vm0, %v173_v9 }
  0x5e   : > { %1735 = vmatmul.msk.f32.gmra.mxu0 %vm188_vm0, %v174_v11 }
  0x66   : > { %1736 = vmatmul.msk.f32.gmra.mxu0 %vm188_vm0, %v175_v15 }
  0x6e   : > { %1737 = vmatmul.msk.f32.gmra.mxu0 %vm188_vm0, %v176_v16 }
  0x76   : > { %1738 = vmatmul.msk.f32.gmra.mxu0 %vm188_vm0, %v177_v17 }
  0x7e   : > { %1739 = vmatmul.msk.f32.gmra.mxu0 %vm188_vm0, %v178_v18 }
  0x86   : > { %1740 = vmatmul.msk.f32.gmra.mxu0 %vm188_vm0, %v179_v19 }
  0xab   : > { %v254_v20 = vpop.f32.mrf.mxu0 }
  0xac   : > { %303 = vrot.lane.b32.xlu0 %v254_v20, %s2025_s30 }
  0xad   : > { %v2186_v31 = vpop.f32.mrf.mxu1 }
  0xb2   : > { %v2184_v30 = vpop.f32.mrf.mxu3 }
  0xb3   : > { %v257_v21 = vpop.f32.mrf.mxu0  ;;  %v2194_v33 = vpop.f32.mrf.mxu2 }
  0xb4   : > { %331 = vrot.lane.b32.xlu0 %v257_v21, %s2025_s30 }
  0xba   : > { %v2196_v34 = vpop.f32.mrf.mxu3 }
  0xbb   : > { %v260_v22 = vpop.f32.mrf.mxu0 }
  0xbc   : > { %358 = vrot.lane.b32.xlu1 %v260_v22, %s2025_s30  ;;  %v1863_v36 = vpack.i.bf16 %v260_v22, %v257_v21 }
  0xc3   : > { %v263_v23 = vpop.f32.mrf.mxu0 }
  0xc4   : > { %385 = vrot.lane.b32.xlu1 %v263_v23, %s2025_s30  ;;  %v1858_v37 = vpack.i.bf16 %v263_v23, %v254_v20 }
  0xcb   : > { %v266_v24 = vpop.f32.mrf.mxu0 }
  0xcc   : > { %412 = vrot.lane.b32.xlu2 %v266_v24, %s2025_s30 }
  0xd3   : > { %v269_v25 = vpop.f32.mrf.mxu0 }
  0xd4   : > { %439 = vrot.lane.b32.xlu2 %v269_v25, %s2025_s30 }
  0xdb   : > { %v272_v26 = vpop.f32.mrf.mxu0 }
  0xdc   : > { %466 = vrot.lane.b32.xlu0 %v272_v26, %s2025_s30  ;;  %v1868_v38 = vpack.i.bf16 %v266_v24, %v272_v26 }
  0xe3   : > { %v2175_v27 = vpop.f32.mrf.mxu0 }
  0xe4   : > { %493 = vrot.lane.b32.xlu1 %v2175_v27, %s2025_s30 }
  0xeb   : > { %v2179_v28 = vpop.f32.mrf.mxu0 }
  0xec   : > { %520 = vrot.lane.b32.xlu2 %v2179_v28, %s2025_s30 }
  0xf3   : > { %v281_v29 = vpop.f32.mrf.mxu0 }
  0xf4   : > { %547 = vrot.lane.b32.xlu0 %v281_v29, %s2025_s30  ;;  %v1873_v39 = vpack.i.bf16 %v281_v29, %v269_v25 }
  0xfb   : > { %v2188_v32 = vpop.f32.mrf.mxu0 }
  0xfc   : > { %628 = vrot.lane.b32.xlu0 %v2186_v31, %s2025_s30  ;;  %574 = vrot.lane.b32.xlu1 %v2188_v32, %s2025_s30 }
 0x103   : > { %v2198_v35 = vpop.f32.mrf.mxu0 }
 0x104   : > { %709 = vrot.lane.b32.xlu0 %v2196_v34, %s2025_s30  ;;  %655 = vrot.lane.b32.xlu1 %v2194_v33, %s2025_s30 }
 0x105   : > { %601 = vrot.lane.b32.xlu2 %v2198_v35, %s2025_s30 }
 0x10c   : > { %1864 = vrot.lane.b32.xlu0 %v1863_v36, %s2026_s3  ;;  %1859 = vrot.lane.b32.xlu1 %v1858_v37, %s2026_s3 }
 0x10d   : > { %682 = vrot.lane.b32.xlu2 %v2184_v30, %s2025_s30 }
 0x114   : > { %1869 = vrot.lane.b32.xlu0 %v1868_v38, %s2026_s3 }
 0x11c   : > { %1874 = vrot.lane.b32.xlu0 %v1873_v39, %s2026_s3 }
 0x11e   : > { %v304_v40 = vpop.permute.xlu0 %303 }
 0x11f   : > { %1745 = vmatpush.xpose.msk.msrb.mxu1 %vm305_vm1, %v304_v40 }
 0x122   : > { %1746 = vmatmul.msk.f32.vlgmr.msrb.gmra.mxu1 %vm305_vm1, %v254_v20 }
 0x126   : > { %v332_v41 = vpop.permute.xlu0 %331  ;;  %v413_v42 = vpop.permute.xlu2 %412 }
 0x127   : > { %1747 = vmatpush.xpose.msk.msrb.mxu2 %vm305_vm1, %v332_v41 }
 0x12a   : > { %1748 = vmatmul.msk.f32.vlgmr.msrb.gmra.mxu2 %vm305_vm1, %v257_v21 }
 0x12b   : > { %1753 = vmatpush.xpose.msk.msra.mxu2 %vm305_vm1, %v413_v42 }
 0x12e   : > { %v359_v43 = vpop.permute.xlu1 %358  ;;  %v440_v44 = vpop.permute.xlu2 %439 }
 0x12f   : > { %1749 = vmatpush.xpose.msk.msrb.mxu3 %vm305_vm1, %v359_v43 }
 0x132   : > { %1750 = vmatmul.msk.f32.vlgmr.msrb.gmra.mxu3 %vm305_vm1, %v260_v22  ;;  %1754 = vmatmul.msk.f32.vlgmr.msra.gmra.mxu2 %vm305_vm1, %v266_v24 }
 0x133   : > { %1755 = vmatpush.xpose.msk.msra.mxu3 %vm305_vm1, %v440_v44 }
 0x136   : > { %v386_v45 = vpop.permute.xlu1 %385 }
 0x137   : > { %1751 = vmatpush.xpose.msk.msra.mxu1 %vm305_vm1, %v386_v45 }
 0x13a   : > { %1752 = vmatmul.msk.f32.vlgmr.msra.gmra.mxu1 %vm305_vm1, %v263_v23  ;;  %1756 = vmatmul.msk.f32.vlgmr.msra.gmra.mxu3 %vm305_vm1, %v269_v25 }
 0x146   : > { %v521_v46 = vpop.permute.xlu2 %520 }
 0x147   : > { %1761 = vmatpush.xpose.msk.msrb.mxu3 %vm305_vm1, %v521_v46 }
 0x14a   : > { %1762 = vmatmul.msk.f32.vlgmr.msrb.gmra.mxu3 %vm305_vm1, %v2179_v28 }
 0x14e   : > { %v467_v47 = vpop.permute.xlu0 %466 }
 0x14f   : > { %1757 = vmatpush.xpose.msk.msrb.mxu1 %vm305_vm1, %v467_v47 }
 0x152   : > { %1758 = vmatmul.msk.f32.vlgmr.msrb.gmra.mxu1 %vm305_vm1, %v272_v26 }
 0x156   : > { %v494_v48 = vpop.permute.xlu1 %493 }
 0x157   : > { %1759 = vmatpush.xpose.msk.msrb.mxu2 %vm305_vm1, %v494_v48 }
 0x15a   : > { %1760 = vmatmul.msk.f32.vlgmr.msrb.gmra.mxu2 %vm305_vm1, %v2175_v27 }
 0x15f   : > { %v602_v49 = vpop.permute.xlu2 %601 }
 0x160   : > { %1767 = vmatpush.xpose.msk.msra.mxu3 %vm305_vm1, %v602_v49 }
 0x163   : > { %1768 = vmatmul.msk.f32.vlgmr.msra.gmra.mxu3 %vm305_vm1, %v2198_v35 }
 0x166   : > { %v548_v50 = vpop.permute.xlu0 %547 }
 0x167   : > { %v683_v51 = vpop.permute.xlu2 %682  ;;  %1763 = vmatpush.xpose.msk.msra.mxu1 %vm305_vm1, %v548_v50 }
 0x168   : > { %1773 = vmatpush.xpose.msk.msrb.mxu3 %vm305_vm1, %v683_v51 }
 0x16a   : > { %1764 = vmatmul.msk.f32.vlgmr.msra.gmra.mxu1 %vm305_vm1, %v281_v29 }
 0x16b   : > { %1774 = vmatmul.msk.f32.vlgmr.msrb.gmra.mxu3 %vm305_vm1, %v2184_v30 }
 0x16e   : > { %v629_v52 = vpop.permute.xlu0 %628  ;;  %v575_v53 = vpop.permute.xlu1 %574 }
 0x16f   : > { %1765 = vmatpush.xpose.msk.msra.mxu2 %vm305_vm1, %v575_v53  ;;  %1769 = vmatpush.xpose.msk.msrb.mxu1 %vm305_vm1, %v629_v52 }
 0x172   : > { %1766 = vmatmul.msk.f32.vlgmr.msra.gmra.mxu2 %vm305_vm1, %v2188_v32  ;;  %1770 = vmatmul.msk.f32.vlgmr.msrb.gmra.mxu1 %vm305_vm1, %v2186_v31 }
 0x176   : > { %v710_v54 = vpop.permute.xlu0 %709  ;;  %v656_v55 = vpop.permute.xlu1 %655 }
 0x177   : > { %1771 = vmatpush.xpose.msk.msrb.mxu2 %vm305_vm1, %v656_v55  ;;  %1775 = vmatpush.xpose.msk.msra.mxu1 %vm305_vm1, %v710_v54 }
 0x17a   : > { %1772 = vmatmul.msk.f32.vlgmr.msrb.gmra.mxu2 %vm305_vm1, %v2194_v33  ;;  %1776 = vmatmul.msk.f32.vlgmr.msra.gmra.mxu1 %vm305_vm1, %v2196_v34 }
 0x17e   : > { %v1865_v56 = vpop.permute.xlu0 %1864  ;;  %v1860_v57 = vpop.permute.xlu1 %1859 }
 0x17f   : > { %v1867_v58 = vunpack.i.h.bf16 %v1865_v56  ;;  %v1866_v59 = vunpack.i.l.bf16 %v1865_v56  ;;  %v1862_v60 = vunpack.i.h.bf16 %v1860_v57  ;;  %v1861_v61 = vunpack.i.l.bf16 %v1860_v57 }
 0x181   : > { %954 = vmatpush.msra.mxu2 %v1861_v61  ;;  %980 = vmatpush.msra.mxu3 %v1866_v59 }
 0x182   : > { %1006 = vmatpush.msrb.mxu1 %v1867_v58 }
 0x183   : > { %1032 = vmatpush.msrb.mxu2 %v1862_v60 }
 0x186   : > { %v2252_v62 = vpop.permute.xlu0 %1869 }
 0x187   : > { %v1872_v63 = vunpack.i.h.bf16 %v2252_v62 }
 0x189   : > { %1058 = vmatpush.msrb.mxu3 %v1872_v63 }
 0x18e   : > { %v2255_v0 = vpop.permute.xlu0 %1874 }
 0x18f   : > { %v1876_v1 = vunpack.i.l.bf16 %v2255_v0 }
 0x191   : > { %1084 = vmatpush.msra.mxu1 %v1876_v1 }
 0x19f   : > { %v327_v6 = vpop.f32.mrf.mxu1 }
 0x1a0   : > { %v2264_v7 = vsel %vm2258_vm2, %v327_v6, -1e+30 }
 0x1a1   : > { %v757_v8 = vsel %vm756_vm3, %v2264_v7, -inf }
 0x1a2   : > { %758 = vmax.xlane.f32.xlu1 %v757_v8 }
 0x1ad   : > { %v354_v9 = vpop.f32.mrf.mxu2 }
 0x1ae   : > { %v2270_v10 = vsel %vm2258_vm2, %v354_v9, -1e+30 }
 0x1af   : > { %v760_v11 = vsel %vm756_vm3, %v2270_v10, -inf }
 0x1b0   : > { %761 = vmax.xlane.f32.xlu0 %v760_v11 }
 0x1b5   : > { %v381_v12 = vpop.f32.mrf.mxu3  ;;  %v435_v21 = vpop.f32.mrf.mxu2 }
 0x1b6   : > { %v2276_v13 = vsel %vm2258_vm2, %v381_v12, -1e+30  ;;  %v2294_v22 = vsel %vm2258_vm2, %v435_v21, -1e+30 }
 0x1b7   : > { %v763_v14 = vsel %vm756_vm3, %v2276_v13, -inf  ;;  %v408_v15 = vpop.f32.mrf.mxu1  ;;  %v769_v23 = vsel %vm756_vm3, %v2294_v22, -inf }
 0x1b8   : > { %764 = vmax.xlane.f32.xlu2 %v763_v14  ;;  %v2282_v16 = vsel %vm2258_vm2, %v408_v15, -1e+30 }
 0x1b9   : > { %v766_v20 = vsel %vm756_vm3, %v2282_v16, -inf }
 0x1bd   : > { %v462_v17 = vpop.f32.mrf.mxu3 }
 0x1be   : > { %v2286_v18 = vsel %vm2258_vm2, %v462_v17, -1e+30 }
 0x1bf   : > { %v772_v19 = vsel %vm756_vm3, %v2286_v18, -inf }
 0x1c0   : > { %773 = vmax.xlane.f32.xlu0 %v772_v19  ;;  %767 = vmax.xlane.f32.xlu2 %v766_v20 }
 0x1c8   : > { %770 = vmax.xlane.f32.xlu2 %v769_v23 }
 0x1cd   : > { %v543_v24 = vpop.f32.mrf.mxu3 }
 0x1ce   : > { %v2300_v25 = vsel %vm2258_vm2, %v543_v24, -1e+30 }
 0x1cf   : > { %v489_v26 = vpop.f32.mrf.mxu1  ;;  %v781_v29 = vsel %vm756_vm3, %v2300_v25, -inf }
 0x1d0   : > { %v2306_v36 = vsel %vm2258_vm2, %v489_v26, -1e+30  ;;  %782 = vmax.xlane.f32.xlu0 %v781_v29 }
 0x1d1   : > { %v775_v37 = vsel %vm756_vm3, %v2306_v36, -inf }
 0x1d2   : > { %776 = vmax.xlane.f32.xlu1 %v775_v37 }
 0x1dd   : > { %v516_v38 = vpop.f32.mrf.mxu2 }
 0x1de   : > { %v2312_v39 = vsel %vm2258_vm2, %v516_v38, -1e+30 }
 0x1df   : > { %v778_v40 = vsel %vm756_vm3, %v2312_v39, -inf }
 0x1e0   : > { %779 = vmax.xlane.f32.xlu2 %v778_v40 }
 0x1e6   : > { %v624_v41 = vpop.f32.mrf.mxu3 }
 0x1e7   : > { %v2318_v42 = vsel %vm2258_vm2, %v624_v41, -1e+30  ;;  %v570_v43 = vpop.f32.mrf.mxu1 }
 0x1e8   : > { %v2322_v44 = vsel %vm2258_vm2, %v570_v43, -1e+30  ;;  %v790_v45 = vsel %vm756_vm3, %v2318_v42, -inf }
 0x1e9   : > { %791 = vmax.xlane.f32.xlu0 %v790_v45  ;;  %v784_v46 = vsel %vm756_vm3, %v2322_v44, -inf }
 0x1ea   : > { %785 = vmax.xlane.f32.xlu1 %v784_v46 }
 0x1ee   : > { %v705_v47 = vpop.f32.mrf.mxu3 }
 0x1ef   : > { %v2330_v48 = vsel %vm2258_vm2, %v705_v47, -1e+30  ;;  %v651_v49 = vpop.f32.mrf.mxu1 }
 0x1f0   : > { %v2334_v50 = vsel %vm2258_vm2, %v651_v49, -1e+30  ;;  %v799_v51 = vsel %vm756_vm3, %v2330_v48, -inf }
 0x1f1   : > { %800 = vmax.xlane.f32.xlu0 %v799_v51  ;;  %v793_v52 = vsel %vm756_vm3, %v2334_v50, -inf }
 0x1f2   : > { %794 = vmax.xlane.f32.xlu1 %v793_v52 }
 0x1f5   : > { %v597_v53 = vpop.f32.mrf.mxu2 }
 0x1f6   : > { %v2342_v54 = vsel %vm2258_vm2, %v597_v53, -1e+30 }
 0x1f7   : > { %v732_v55 = vpop.f32.mrf.mxu1  ;;  %v787_v56 = vsel %vm756_vm3, %v2342_v54, -inf }
 0x1f8   : > { %v2348_v57 = vsel %vm2258_vm2, %v732_v55, -1e+30  ;;  %788 = vmax.xlane.f32.xlu2 %v787_v56 }
 0x1f9   : > { %v802_v58 = vsel %vm756_vm3, %v2348_v57, -inf }
 0x1fa   : > { %803 = vmax.xlane.f32.xlu1 %v802_v58 }
 0x1fd   : > { %v678_v59 = vpop.f32.mrf.mxu2 }
 0x1fe   : > { %v2354_v60 = vsel %vm2258_vm2, %v678_v59, -1e+30 }
 0x1ff   : > { %v796_v61 = vsel %vm756_vm3, %v2354_v60, -inf }
 0x200   : > { %797 = vmax.xlane.f32.xlu2 %v796_v61 }
 0x215   : > { %v759_v63 = vpop.xlane.xlu1 %758 }
 0x216   : > { %v805_v1 = vsub.f32 %v2264_v7, %v759_v63 }
 0x218   : > { %v821_v2 = vmul.f32 1.442695, %v805_v1 }
 0x21a   : > { %1893 = vpow2.f32 %v821_v2 }
 0x220   : > { %v2359_v3 = vpop.eup %1893 }
 0x221   : > { %v853_v4 = vsel %vm756_vm3, %v2359_v3, 0.0 }
 0x222   : > { %854 = vadd.xlane.f32.xlu1 %v853_v4 }
 0x223   : > { %v762_v6 = vpop.xlane.xlu0 %761 }
 0x224   : > { %v806_v5 = vsub.f32 %v2270_v10, %v762_v6 }
 0x226   : > { %v823_v8 = vmul.f32 1.442695, %v806_v5 }
 0x228   : > { %1895 = vpow2.f32 %v823_v8 }
 0x22b   : > { %v765_v9 = vpop.xlane.xlu2 %764 }
 0x22c   : > { %v807_v11 = vsub.f32 %v2276_v13, %v765_v9 }
 0x22e   : > { %v2365_v12 = vpop.eup %1895  ;;  %v825_v14 = vmul.f32 1.442695, %v807_v11 }
 0x22f   : > { %v856_v7 = vsel %vm756_vm3, %v2365_v12, 0.0 }
 0x230   : > { %1897 = vpow2.f32 %v825_v14  ;;  %857 = vadd.xlane.f32.xlu0 %v856_v7 }
 0x233   : > { %v768_v15 = vpop.xlane.xlu2 %767  ;;  %v774_v21 = vpop.xlane.xlu0 %773 }
 0x234   : > { %v808_v17 = vsub.f32 %v2282_v16, %v768_v15  ;;  %v810_v29 = vsub.f32 %v2286_v18, %v774_v21 }
 0x236   : > { %v2370_v19 = vpop.eup %1897  ;;  %v827_v20 = vmul.f32 1.442695, %v808_v17  ;;  %v831_v37 = vmul.f32 1.442695, %v810_v29 }
 0x237   : > { %v859_v10 = vsel %vm756_vm3, %v2370_v19, 0.0 }
 0x238   : > { %860 = vadd.xlane.f32.xlu2 %v859_v10  ;;  %1899 = vpow2.f32 %v827_v20 }
 0x23b   : > { %v771_v13 = vpop.xlane.xlu2 %770 }
 0x23c   : > { %v809_v23 = vsub.f32 %v2294_v22, %v771_v13 }
 0x23e   : > { %v829_v24 = vmul.f32 1.442695, %v809_v23  ;;  %v2375_v26 = vpop.eup %1899 }
 0x23f   : > { %v862_v16 = vsel %vm756_vm3, %v2375_v26, 0.0 }
 0x240   : > { %1901 = vpow2.f32 %v829_v24  ;;  %863 = vadd.xlane.f32.xlu2 %v862_v16 }
 0x241   : > { %1903 = vpow2.f32 %v831_v37 }
 0x245   : > { %v777_v38 = vpop.xlane.xlu1 %776 }
 0x246   : > { %v2380_v40 = vpop.eup %1901  ;;  %v811_v41 = vsub.f32 %v2306_v36, %v777_v38  ;;  %v783_v36 = vpop.xlane.xlu0 %782  ;;  %v1878_v38 = vpack.i.bf16 %v2179_v28, %v2175_v27 }
 0x247   : > { %v865_v22 = vsel %vm756_vm3, %v2380_v40, 0.0  ;;  %v2385_v45 = vpop.eup %1903  ;;  %v813_v52 = vsub.f32 %v2300_v25, %v783_v36  ;;  %v1871_v36 = vunpack.i.l.bf16 %v2252_v62 }
 0x248   : > { %v833_v43 = vmul.f32 1.442695, %v811_v41  ;;  %866 = vadd.xlane.f32.xlu2 %v865_v22  ;;  %v868_v46 = vsel %vm756_vm3, %v2385_v45, 0.0  ;;  %v1888_v41 = vpack.i.bf16 %v2196_v34, %v2198_v35 }
 0x249   : > { %v837_v55 = vmul.f32 1.442695, %v813_v52 }
 0x24a   : > { %1905 = vpow2.f32 %v833_v43  ;;  %v1883_v43 = vpack.i.bf16 %v2188_v32, %v2186_v31 }
 0x250   : > { %v2387_v18 = vpop.eup %1905  ;;  %869 = vadd.xlane.f32.xlu2 %v868_v46 }
 0x251   : > { %v871_v47 = vsel %vm756_vm3, %v2387_v18, 0.0 }
 0x252   : > { %872 = vadd.xlane.f32.xlu0 %v871_v47 }
 0x253   : > { %v780_v49 = vpop.xlane.xlu2 %779 }
 0x254   : > { %v812_v51 = vsub.f32 %v2312_v39, %v780_v49 }
 0x256   : > { %v835_v53 = vmul.f32 1.442695, %v812_v51 }
 0x258   : > { %1907 = vpow2.f32 %v835_v53  ;;  %v1877_v53 = vunpack.i.h.bf16 %v2255_v0 }
 0x259   : > { %1909 = vpow2.f32 %v837_v55 }
 0x25c   : > { %v792_v1 = vpop.xlane.xlu0 %791 }
 0x25d   : > { %v786_v56 = vpop.xlane.xlu1 %785  ;;  %v816_v20 = vsub.f32 %v2318_v42, %v792_v1 }
 0x25e   : > { %v2395_v58 = vpop.eup %1907  ;;  %v814_v59 = vsub.f32 %v2322_v44, %v786_v56 }
 0x25f   : > { %v874_v61 = vsel %vm756_vm3, %v2395_v58, 0.0  ;;  %v2400_v2 = vpop.eup %1909  ;;  %v843_v23 = vmul.f32 1.442695, %v816_v20 }
 0x260   : > { %v839_v63 = vmul.f32 1.442695, %v814_v59  ;;  %875 = vadd.xlane.f32.xlu2 %v874_v61  ;;  %v877_v4 = vsel %vm756_vm3, %v2400_v2, 0.0 }
 0x262   : > { %1911 = vpow2.f32 %v839_v63 }
 0x264   : > { %v801_v8 = vpop.xlane.xlu0 %800 }
 0x265   : > { %v795_v39 = vpop.xlane.xlu1 %794  ;;  %v819_v7 = vsub.f32 %v2330_v48, %v801_v8 }
 0x266   : > { %v817_v25 = vsub.f32 %v2334_v50, %v795_v39 }
 0x267   : > { %v849_v21 = vmul.f32 1.442695, %v819_v7 }
 0x268   : > { %v2405_v6 = vpop.eup %1911  ;;  %v845_v5 = vmul.f32 1.442695, %v817_v25  ;;  %878 = vadd.xlane.f32.xlu2 %v877_v4 }
 0x269   : > { %v880_v44 = vsel %vm756_vm3, %v2405_v6, 0.0 }
 0x26a   : > { %1913 = vpow2.f32 %v845_v5  ;;  %881 = vadd.xlane.f32.xlu1 %v880_v44 }
 0x26b   : > { %v789_v9 = vpop.xlane.xlu2 %788 }
 0x26c   : > { %v815_v11 = vsub.f32 %v2342_v54, %v789_v9 }
 0x26d   : > { %v804_v14 = vpop.xlane.xlu1 %803 }
 0x26e   : > { %v841_v50 = vmul.f32 1.442695, %v815_v11  ;;  %v820_v15 = vsub.f32 %v2348_v57, %v804_v14 }
 0x270   : > { %v2412_v17 = vpop.eup %1913  ;;  %1915 = vpow2.f32 %v841_v50  ;;  %v851_v10 = vmul.f32 1.442695, %v820_v15 }
 0x271   : > { %v889_v13 = vsel %vm756_vm3, %v2412_v17, 0.0 }
 0x272   : > { %1917 = vpow2.f32 %v851_v10  ;;  %890 = vadd.xlane.f32.xlu2 %v889_v13 }
 0x273   : > { %1919 = vpow2.f32 %v849_v21  ;;  %v798_v27 = vpop.xlane.xlu2 %797 }
 0x274   : > { %1921 = vpow2.f32 %v843_v23  ;;  %v818_v28 = vsub.f32 %v2354_v60, %v798_v27 }
 0x276   : > { %v2417_v54 = vpop.eup %1915  ;;  %v847_v35 = vmul.f32 1.442695, %v818_v28 }
 0x277   : > { %v883_v48 = vsel %vm756_vm3, %v2417_v54, 0.0 }
 0x278   : > { %v2421_v57 = vpop.eup %1917  ;;  %884 = vadd.xlane.f32.xlu0 %v883_v48 }
 0x279   : > { %v898_v42 = vsel %vm756_vm3, %v2421_v57, 0.0  ;;  %v2425_v24 = vpop.eup %1919 }
 0x27a   : > { %899 = vadd.xlane.f32.xlu1 %v898_v42  ;;  %v2427_v29 = vpop.eup %1921  ;;  %v895_v16 = vsel %vm756_vm3, %v2425_v24, 0.0 }
 0x27b   : > { %v886_v37 = vsel %vm756_vm3, %v2427_v29, 0.0 }
 0x280   : > { %896 = vadd.xlane.f32.xlu0 %v895_v16 }
 0x282   : > { %887 = vadd.xlane.f32.xlu1 %v886_v37 }
 0x28a   : > { %1879 = vrot.lane.b32.xlu2 %v1878_v38, %s2026_s3 }
 0x294   : > { %1889 = vrot.lane.b32.xlu0 %v1888_v41, %s2026_s3 }
 0x295   : > { %v855_v22 = vpop.xlane.xlu1 %854 }
 0x296   : > { %1923 = vrcp.f32 %v855_v22 }
 0x29b   : > { %1884 = vrot.lane.b32.xlu1 %v1883_v43, %s2026_s3 }
 0x29c   : > { %v1924_v46 = vpop.eup %1923 }
 0x29d   : > { %v917_v47 = vmul.f32 %v1924_v46, %v2359_v3 }
 0x29f   : > { %1777 = vmatmul.msk.f32.vlgmr.msra.gmra.mxu2 %vm756_vm3, %v917_v47 }
 0x2a0   : > { %1110 = vmatpush.msra.mxu2 %v1871_v36 }
 0x2a3   : > { %1271 = vrot.lane.b32.xlu1 %v2194_v33, %s2026_s3  ;;  %v858_v34 = vpop.xlane.xlu0 %857 }
 0x2a4   : > { %1925 = vrcp.f32 %v858_v34 }
 0x2a5   : > { %1927 = vpow2.f32 %v847_v35  ;;  %v2027_v35 = vmov 1983009808  }
 0x2aa   : > { %v1926_v31 = vpop.eup %1925 }
 0x2ab   : > { %v918_v32 = vmul.f32 %v1926_v31, %v2365_v12  ;;  %1297 = vrot.lane.b32.xlu1 %v2184_v30, %s2026_s3  ;;  %v861_v62 = vpop.xlane.xlu2 %860  ;;  %v2452_v3 = vpop.eup %1927  ;;  %v1355_v31 = vunpack.c.l.s4 %v2027_v35 }
 0x2ac   : > { %1929 = vrcp.f32 %v861_v62  ;;  %v892_v33 = vsel %vm756_vm3, %v2452_v3, 0.0 }
 0x2ad   : > { %1778 = vmatmul.msk.f32.vlgmr.msra.gmra.mxu3 %vm756_vm3, %v918_v32 }
 0x2b2   : > { %v1930_v60 = vpop.eup %1929 }
 0x2b3   : > { %v919_v49 = vmul.f32 %v1930_v60, %v2370_v19  ;;  %893 = vadd.xlane.f32.xlu2 %v892_v33  ;;  %v864_v51 = vpop.xlane.xlu2 %863  ;;  %v2486_v33 = vunpack.c.0.s8 %v1355_v31 }
 0x2b4   : > { %1931 = vrcp.f32 %v864_v51 }
 0x2b5   : > { %1779 = vmatmul.msk.f32.vlgmr.msrb.gmra.mxu1 %vm756_vm3, %v919_v49 }
 0x2ba   : > { %v1932_v12 = vpop.eup %1931 }
 0x2bb   : > { %v920_v30 = vmul.f32 %v1932_v12, %v2375_v26  ;;  %v867_v52 = vpop.xlane.xlu2 %866 }
 0x2bc   : > { %1933 = vrcp.f32 %v867_v52 }
 0x2bd   : > { %1780 = vmatmul.msk.f32.vlgmr.msrb.gmra.mxu2 %vm756_vm3, %v920_v30 }
 0x2be   : > { %1188 = vmatpush.msrb.mxu2 %v1877_v53 }
 0x2c2   : > { %v1934_v55 = vpop.eup %1933 }
 0x2c3   : > { %v921_v56 = vmul.f32 %v1934_v55, %v2380_v40  ;;  %v870_v59 = vpop.xlane.xlu2 %869 }
 0x2c4   : > { %1935 = vrcp.f32 %v870_v59 }
 0x2c5   : > { %v873_v19 = vpop.xlane.xlu0 %872  ;;  %1781 = vmatmul.msk.f32.vlgmr.msrb.gmra.mxu3 %vm756_vm3, %v921_v56 }
 0x2c6   : > { %1937 = vrcp.f32 %v873_v19 }
 0x2ca   : > { %v1936_v61 = vpop.eup %1935 }
 0x2cb   : > { %v922_v26 = vmul.f32 %v1936_v61, %v2385_v45  ;;  %v2028_v61 = vmov 1934713408  }
 0x2cc   : > { %v1938_v63 = vpop.eup %1937 }
 0x2cd   : > { %v923_v1 = vmul.f32 %v1938_v63, %v2387_v18  ;;  %1782 = vmatmul.msk.f32.vlgmr.msra.gmra.mxu1 %vm756_vm3, %v922_v26  ;;  %v1403_v63 = vunpack.c.l.s4 %v2028_v61 }
 0x2cf   : > { %1783 = vmatmul.msk.f32.vlgmr.msra.gmra.mxu2 %vm756_vm3, %v923_v1 }
 0x2d3   : > { %v876_v0 = vpop.xlane.xlu2 %875 }
 0x2db   : > { %v879_v39 = vpop.xlane.xlu2 %878 }
 0x2dd   : > { %v882_v25 = vpop.xlane.xlu1 %881 }
 0x2de   : > { %1939 = vrcp.f32 %v882_v25 }
 0x2df   : > { %1941 = vrcp.f32 %v876_v0 }
 0x2e0   : > { %1943 = vrcp.f32 %v879_v39 }
 0x2e4   : > { %v1940_v40 = vpop.eup %1939 }
 0x2e5   : > { %v926_v4 = vmul.f32 %v1940_v40, %v2405_v6  ;;  %v891_v5 = vpop.xlane.xlu2 %890  ;;  %v1942_v44 = vpop.eup %1941 }
 0x2e6   : > { %v1944_v45 = vpop.eup %1943  ;;  %v924_v11 = vmul.f32 %v1942_v44, %v2395_v58 }
 0x2e7   : > { %1786 = vmatmul.msk.f32.vlgmr.msrb.gmra.mxu2 %vm756_vm3, %v926_v4  ;;  %v925_v14 = vmul.f32 %v1944_v45, %v2400_v2 }
 0x2eb   : > { %v885_v7 = vpop.xlane.xlu0 %884 }
 0x2ed   : > { %v1880_v8 = vpop.permute.xlu2 %1879  ;;  %v900_v6 = vpop.xlane.xlu1 %899 }
 0x2ee   : > { %v1882_v18 = vunpack.i.h.bf16 %v1880_v8  ;;  %v1881_v9 = vunpack.i.l.bf16 %v1880_v8 }
 0x2f0   : > { %1136 = vmatpush.msra.mxu3 %v1881_v9  ;;  %1162 = vmatpush.msrb.mxu1 %v1882_v18 }
 0x2f1   : > { %1784 = vmatmul.msk.f32.vlgmr.msra.gmra.mxu3 %vm756_vm3, %v924_v11  ;;  %1785 = vmatmul.msk.f32.vlgmr.msrb.gmra.mxu1 %vm756_vm3, %v925_v14 }
 0x2f3   : > { %v897_v15 = vpop.xlane.xlu0 %896 }
 0x2f5   : > { %v888_v50 = vpop.xlane.xlu1 %887 }
 0x2f6   : > { %1945 = vrcp.f32 %v888_v50 }
 0x2f7   : > { %1947 = vrcp.f32 %v891_v5  ;;  %v2497_v5 = vunpack.c.0.s8 %v1403_v63 }
 0x2f8   : > { %1949 = vrcp.f32 %v885_v7 }
 0x2f9   : > { %1951 = vrcp.f32 %v900_v6 }
 0x2fa   : > { %1953 = vrcp.f32 %v897_v15 }
 0x2fc   : > { %v1946_v20 = vpop.eup %1945 }
 0x2fd   : > { %v928_v58 = vmul.f32 %v1946_v20, %v2427_v29  ;;  %v1948_v2 = vpop.eup %1947 }
 0x2fe   : > { %v1950_v21 = vpop.eup %1949  ;;  %v929_v16 = vmul.f32 %v1948_v2, %v2412_v17 }
 0x2ff   : > { %v927_v37 = vmul.f32 %v1950_v21, %v2417_v54  ;;  %v1952_v29 = vpop.eup %1951 }
 0x300   : > { %v932_v22 = vmul.f32 %v1952_v29, %v2421_v57  ;;  %v1954_v43 = vpop.eup %1953 }
 0x301   : > { %v931_v17 = vmul.f32 %v1954_v43, %v2425_v24 }
 0x306   : > { %v1890_v10 = vpop.permute.xlu0 %1889 }
 0x307   : > { %v1891_v13 = vunpack.i.l.bf16 %v1890_v10  ;;  %v1892_v38 = vunpack.i.h.bf16 %v1890_v10 }
 0x309   : > { %1240 = vmatpush.msra.mxu1 %v1891_v13 }
 0x30a   : > { %1788 = vmatmul.msk.f32.vlgmr.msra.gmra.mxu1 %vm756_vm3, %v928_v58 }
 0x30d   : > { %v1885_v23 = vpop.permute.xlu1 %1884 }
 0x30e   : > { %v1887_v48 = vunpack.i.h.bf16 %v1885_v23  ;;  %v1886_v42 = vunpack.i.l.bf16 %v1885_v23 }
 0x310   : > { %1214 = vmatpush.msrb.mxu3 %v1887_v48  ;;  %1266 = vmatpush.msra.mxu2 %v1886_v42 }
 0x311   : > { %1787 = vmatmul.msk.f32.vlgmr.msrb.gmra.mxu3 %vm756_vm3, %v927_v37  ;;  %1789 = vmatmul.msk.f32.vlgmr.msra.gmra.mxu2 %vm756_vm3, %v929_v16 }
 0x312   : > { %1344 = vmatpush.msrb.mxu2 %v1892_v38 }
 0x315   : > { %v1272_v41 = vpop.permute.xlu1 %1271 }
 0x316   : > { %1292 = vmatpush.msra.mxu3 %v1272_v41 }
 0x319   : > { %1792 = vmatmul.msk.f32.vlgmr.msrb.gmra.mxu2 %vm756_vm3, %v932_v22 }
 0x31d   : > { %v1298_v54 = vpop.permute.xlu1 %1297 }
 0x31e   : > { %1318 = vmatpush.msrb.mxu1 %v1298_v54 }
 0x31f   : > { %1791 = vmatmul.msk.f32.vlgmr.msrb.gmra.mxu1 %vm756_vm3, %v931_v17 }
 0x322   : > { %v956_v27 = vpop.f32.mrf.mxu2 }
 0x323   : > { %v1352_v24 = vrot.slane %v956_v27, 4 }
 0x326   : > { %v894_v46 = vpop.xlane.xlu2 %893 }
 0x327   : > { %1955 = vrcp.f32 %v894_v46 }
 0x32d   : > { %v1956_v47 = vpop.eup %1955 }
 0x32e   : > { %v930_v36 = vmul.f32 %v1956_v47, %v2452_v3 }
 0x330   : > { %1790 = vmatmul.msk.f32.vlgmr.msra.gmra.mxu3 %vm756_vm3, %v930_v36  ;;  %v982_v28 = vpop.f32.mrf.mxu3 }
 0x331   : > { %v1364_v32 = vrot.slane %v982_v28, 4 }
 0x332   : > { %v1008_v57 = vpop.f32.mrf.mxu1 }
 0x333   : > { %v1349_v62 = vrot.slane %v1008_v57, 4  ;;  %v1353_v51 = vsel %vm1350_vm4, %v1008_v57, %v1352_v24 }
 0x334   : > { %v1361_v53 = vperm.slane %v1353_v51, %v2486_v33 }
 0x335   : > { %v1351_v3 = vsel %vm1350_vm4, %v1349_v62, %v956_v27 }
 0x336   : > { %v1357_v56 = vperm.slane %v1351_v3, %v2486_v33  ;;  %v1412_v39 = vrot.slane %v1361_v53, 4 }
 0x338   : > { %v1400_v40 = vrot.slane %v1357_v56, 4 }
 0x340   : > { %v1034_v34 = vpop.f32.mrf.mxu2 }
 0x341   : > { %v1365_v60 = vsel %vm1350_vm4, %v1034_v34, %v1364_v32  ;;  %v1362_v49 = vrot.slane %v1034_v34, 4 }
 0x342   : > { %v1373_v12 = vperm.slane %v1365_v60, %v2486_v33 }
 0x343   : > { %v1363_v55 = vsel %vm1350_vm4, %v1362_v49, %v982_v28 }
 0x344   : > { %v1410_v26 = vrot.slane %v1373_v12, 4  ;;  %v1369_v1 = vperm.slane %v1363_v55, %v2486_v33  ;;  %v1413_v45 = vsel %vm1350_vm4, %v1373_v12, %v1412_v39 }
 0x345   : > { %v1421_v50 = vperm.slane %v1413_v45, %v2497_v5 }
 0x346   : > { %v1411_v8 = vsel %vm1350_vm4, %v1410_v26, %v1361_v53  ;;  %v1401_v9 = vsel %vm1350_vm4, %v1369_v1, %v1400_v40  ;;  %v1398_v58 = vrot.slane %v1369_v1, 4 }
 0x347   : > { %v1417_v15 = vperm.slane %v1411_v8, %v2497_v5  ;;  %v1409_v13 = vperm.slane %v1401_v9, %v2497_v5  ;;  %v1460_v38 = vrot.slane %v1421_v50, 4 }
 0x348   : > { %v1060_v30 = vpop.f32.mrf.mxu3  ;;  %v1399_v36 = vsel %vm1350_vm4, %v1398_v58, %v1357_v56 }
 0x349   : > { %v1376_v59 = vrot.slane %v1060_v30, 4  ;;  %v1456_v37 = vrot.slane %v1417_v15, 4  ;;  %v1452_v43 = vrot.slane %v1409_v13, 4  ;;  %v1405_v31 = vperm.slane %v1399_v36, %v2497_v5 }
 0x34a   : > { %v1086_v25 = vpop.f32.mrf.mxu1 }
 0x34b   : > { %v1388_v18 = vrot.slane %v1086_v25, 4  ;;  %v1448_v60 = vrot.slane %v1405_v31, 4 }
 0x352   : > { %v1112_v52 = vpop.f32.mrf.mxu2 }
 0x353   : > { %v1374_v19 = vrot.slane %v1112_v52, 4  ;;  %v1377_v0 = vsel %vm1350_vm4, %v1112_v52, %v1376_v59 }
 0x354   : > { %v1385_v44 = vperm.slane %v1377_v0, %v2486_v33 }
 0x355   : > { %v1375_v4 = vsel %vm1350_vm4, %v1374_v19, %v1060_v30 }
 0x356   : > { %v1381_v11 = vperm.slane %v1375_v4, %v2486_v33  ;;  %v1436_v20 = vrot.slane %v1385_v44, 4 }
 0x358   : > { %v1424_v21 = vrot.slane %v1381_v11, 4 }
 0x36a   : > { %v1190_v52 = vpop.f32.mrf.mxu2 }
 0x36b   : > { %v1476_v61 = vrot.slane %v1190_v52, 4 }
 0x36e   : > { %v1164_v30 = vpop.f32.mrf.mxu1 }
 0x36f   : > { %v1464_v26 = vrot.slane %v1164_v30, 4 }
 0x374   : > { %v1138_v14 = vpop.f32.mrf.mxu3 }
 0x375   : > { %v1386_v6 = vrot.slane %v1138_v14, 4  ;;  %v1389_v7 = vsel %vm1350_vm4, %v1138_v14, %v1388_v18 }
 0x376   : > { %v1397_v10 = vperm.slane %v1389_v7, %v2486_v33 }
 0x377   : > { %v1387_v2 = vsel %vm1350_vm4, %v1386_v6, %v1086_v25 }
 0x378   : > { %v1393_v23 = vperm.slane %v1387_v2, %v2486_v33  ;;  %v1434_v48 = vrot.slane %v1397_v10, 4  ;;  %v1437_v42 = vsel %vm1350_vm4, %v1397_v10, %v1436_v20 }
 0x379   : > { %v1445_v16 = vperm.slane %v1437_v42, %v2497_v5 }
 0x37a   : > { %v1422_v29 = vrot.slane %v1393_v23, 4  ;;  %v1435_v41 = vsel %vm1350_vm4, %v1434_v48, %v1385_v44  ;;  %v1425_v22 = vsel %vm1350_vm4, %v1393_v23, %v1424_v21 }
 0x37b   : > { %v1458_v17 = vrot.slane %v1445_v16, 4  ;;  %v1441_v54 = vperm.slane %v1435_v41, %v2497_v5  ;;  %v1433_v46 = vperm.slane %v1425_v22, %v2497_v5  ;;  %v2518_v47 = vsel %vm1350_vm4, %v1445_v16, %v1460_v38 }
 0x37c   : > { %v1423_v27 = vsel %vm1350_vm4, %v1422_v29, %v1381_v11 }
 0x37d   : > { %v1459_v28 = vsel %vm1350_vm4, %v1458_v17, %v1421_v50  ;;  %v1457_v34 = vsel %vm1350_vm4, %v1441_v54, %v1456_v37  ;;  %v1453_v57 = vsel %vm1350_vm4, %v1433_v46, %v1452_v43  ;;  %v1429_v35 = vperm.slane %v1423_v27, %v2497_v5 }
 0x37e   : > { %1616 = vrot.lane.b32.xlu2 %v1459_v28, %s2026_s3  ;;  %1608 = vrot.lane.b32.xlu0 %v1457_v34, %s2029_s4  ;;  %v1450_v62 = vrot.slane %v1433_v46, 4  ;;  %v1454_v3 = vrot.slane %v1441_v54, 4 }
 0x37f   : > { %1592 = vrot.lane.b32.xlu1 %v1453_v57, %s2030_s5  ;;  %v1446_v32 = vrot.slane %v1429_v35, 4  ;;  %v1449_v49 = vsel %vm1350_vm4, %v1429_v35, %v1448_v60 }
 0x380   : > { %v1451_v51 = vsel %vm1350_vm4, %v1450_v62, %v1409_v13  ;;  %v1455_v12 = vsel %vm1350_vm4, %v1454_v3, %v1417_v15 }
 0x381   : > { %v2531_v24 = vsel %vm1350_vm4, %v1446_v32, %v1405_v31 }
 0x386   : > { %1576 = vrot.lane.b32.xlu2 %v1449_v49, %s2031_s6 }
 0x387   : > { %1584 = vrot.lane.b32.xlu1 %v1451_v51, %s2032_s7  ;;  %v1242_v53 = vpop.f32.mrf.mxu1 }
 0x388   : > { %v1474_v59 = vrot.slane %v1242_v53, 4  ;;  %v1477_v1 = vsel %vm1350_vm4, %v1242_v53, %v1476_v61 }
 0x389   : > { %v1485_v4 = vperm.slane %v1477_v1, %v2486_v33 }
 0x38a   : > { %v1475_v63 = vsel %vm1350_vm4, %v1474_v59, %v1190_v52 }
 0x38b   : > { %v1481_v39 = vperm.slane %v1475_v63, %v2486_v33  ;;  %v1522_v14 = vrot.slane %v1485_v4, 4 }
 0x38d   : > { %v1510_v18 = vrot.slane %v1481_v39, 4 }
 0x38f   : > { %1600 = vrot.lane.b32.xlu1 %v1455_v12, %s2033_s8 }
 0x394   : > { %v1216_v55 = vpop.f32.mrf.mxu3  ;;  %v1268_v56 = vpop.f32.mrf.mxu2 }
 0x395   : > { %v1462_v19 = vrot.slane %v1216_v55, 4  ;;  %v1465_v40 = vsel %vm1350_vm4, %v1216_v55, %v1464_v26  ;;  %v1488_v50 = vrot.slane %v1268_v56, 4 }
 0x396   : > { %v1473_v9 = vperm.slane %v1465_v40, %v2486_v33 }
 0x397   : > { %v1463_v0 = vsel %vm1350_vm4, %v1462_v19, %v1164_v30 }
 0x398   : > { %v1469_v44 = vperm.slane %v1463_v0, %v2486_v33  ;;  %v1523_v13 = vsel %vm1350_vm4, %v1522_v14, %v1473_v9  ;;  %v1524_v54 = vrot.slane %v1473_v9, 4 }
 0x399   : > { %v1529_v38 = vperm.slane %v1523_v13, %v2497_v5 }
 0x39a   : > { %v1511_v7 = vsel %vm1350_vm4, %v1510_v18, %v1469_v44  ;;  %v1512_v48 = vrot.slane %v1469_v44, 4  ;;  %v1525_v51 = vsel %vm1350_vm4, %v1485_v4, %v1524_v54 }
 0x39b   : > { %v1517_v23 = vperm.slane %v1511_v7, %v2497_v5  ;;  %v1568_v35 = vrot.slane %v1529_v38, 4  ;;  %v1533_v53 = vperm.slane %v1525_v51, %v2497_v5 }
 0x39c   : > { %v1320_v25 = vpop.f32.mrf.mxu1  ;;  %v1346_v45 = vpop.f32.mrf.mxu2  ;;  %v1513_v27 = vsel %vm1350_vm4, %v1481_v39, %v1512_v48 }
 0x39d   : > { %v1486_v8 = vrot.slane %v1320_v25, 4  ;;  %v1498_v11 = vrot.slane %v1346_v45, 4  ;;  %v1489_v2 = vsel %vm1350_vm4, %v1320_v25, %v1488_v50  ;;  %v1560_v17 = vrot.slane %v1517_v23, 4 }
 0x39e   : > { %v1497_v29 = vperm.slane %v1489_v2, %v2486_v33  ;;  %v1521_v62 = vperm.slane %v1513_v27, %v2497_v5  ;;  %v1572_v59 = vrot.slane %v1533_v53, 4 }
 0x39f   : > { %v1487_v15 = vsel %vm1350_vm4, %v1486_v8, %v1268_v56 }
 0x3a0   : > { %v1493_v42 = vperm.slane %v1487_v15, %v2486_v33  ;;  %v1548_v49 = vrot.slane %v1497_v29, 4  ;;  %v1564_v52 = vrot.slane %v1521_v62, 4 }
 0x3a2   : > { %v1536_v46 = vrot.slane %v1493_v42, 4 }
 0x3b3   : > { %v1294_v6 = vpop.f32.mrf.mxu3 }
 0x3b4   : > { %v1499_v20 = vsel %vm1350_vm4, %v1498_v11, %v1294_v6  ;;  %v1500_v10 = vrot.slane %v1294_v6, 4 }
 0x3b5   : > { %v1505_v58 = vperm.slane %v1499_v20, %v2486_v33 }
 0x3b6   : > { %v1501_v21 = vsel %vm1350_vm4, %v1346_v45, %v1500_v10 }
 0x3b7   : > { %v1509_v16 = vperm.slane %v1501_v21, %v2486_v33  ;;  %v1534_v37 = vrot.slane %v1505_v58, 4  ;;  %v1537_v33 = vsel %vm1350_vm4, %v1505_v58, %v1536_v46 }
 0x3b8   : > { %v1545_v12 = vperm.slane %v1537_v33, %v2497_v5 }
 0x3b9   : > { %v1546_v41 = vrot.slane %v1509_v16, 4  ;;  %v1535_v22 = vsel %vm1350_vm4, %v1534_v37, %v1493_v42  ;;  %v1549_v30 = vsel %vm1350_vm4, %v1509_v16, %v1548_v49 }
 0x3ba   : > { %v1541_v43 = vperm.slane %v1535_v22, %v2497_v5  ;;  %v1565_v55 = vsel %vm1350_vm4, %v1545_v12, %v1564_v52  ;;  %v1557_v56 = vperm.slane %v1549_v30, %v2497_v5  ;;  %v1562_v61 = vrot.slane %v1545_v12, 4 }
 0x3bb   : > { %v1547_v36 = vsel %vm1350_vm4, %v1546_v41, %v1497_v29 }
 0x3bc   : > { %v1561_v28 = vsel %vm1350_vm4, %v1541_v43, %v1560_v17  ;;  %v1558_v34 = vrot.slane %v1541_v43, 4  ;;  %v1553_v57 = vperm.slane %v1547_v36, %v2497_v5  ;;  %v1573_v19 = vsel %vm1350_vm4, %v1557_v56, %v1572_v59 }
 0x3bd   : > { %1578 = vrot.lane.b32.xlu0 %v1561_v28, %s2031_s6  ;;  %v1563_v63 = vsel %vm1350_vm4, %v1562_v61, %v1521_v62  ;;  %v1570_v26 = vrot.slane %v1557_v56, 4 }
 0x3be   : > { %v1569_v31 = vsel %vm1350_vm4, %v1553_v57, %v1568_v35  ;;  %v1566_v32 = vrot.slane %v1553_v57, 4  ;;  %v1559_v60 = vsel %vm1350_vm4, %v1558_v34, %v1517_v23 }
 0x3bf   : > { %1610 = vrot.lane.b32.xlu1 %v1569_v31, %s2029_s4  ;;  %v1571_v1 = vsel %vm1350_vm4, %v1570_v26, %v1533_v53 }
 0x3c0   : > { %v1567_v3 = vsel %vm1350_vm4, %v1566_v32, %v1529_v38 }
 0x3c1   : > { %1602 = vrot.lane.b32.xlu2 %v1567_v3, %s2033_s8 }
 0x3c5   : > { %1594 = vrot.lane.b32.xlu0 %v1565_v55, %s2030_s5 }
 0x3c7   : > { %1624 = vrot.lane.b32.xlu1 %v2518_v47, %s2025_s30 }
 0x3c9   : > { %1626 = vrot.lane.b32.xlu2 %v1573_v19, %s2025_s30 }
 0x3cd   : > { %1586 = vrot.lane.b32.xlu0 %v1563_v63, %s2032_s7 }
 0x3d5   : > { %1618 = vrot.lane.b32.xlu0 %v1571_v1, %s2026_s3 }
 0x3d8   : > { %v1617_v39 = vpop.permute.xlu2 %1616 }
 0x3e0   : > { %v1577_v47 = vpop.permute.xlu2 %1576 }
 0x3e1   : > { %v1630_v4 = vsel %vm305_vm1, %v2531_v24, %v1577_v47 }
 0x3f0   : > { %v1609_v25 = vpop.permute.xlu0 %1608 }
 0x3f1   : > { %v1593_v5 = vpop.permute.xlu1 %1592 }
 0x3f9   : > { %v1585_v0 = vpop.permute.xlu1 %1584 }
 0x3fa   : > { %v1632_v44 = vsel %vm188_vm0, %v1630_v4, %v1585_v0 }
 0x3fb   : > { %v1635_v18 = vsel %vm1634_vm5, %v1632_v44, %v1593_v5 }
 0x401   : > { %v1601_v40 = vpop.permute.xlu1 %1600 }
 0x402   : > { %v1638_v9 = vsel %vm1637_vm6, %v1635_v18, %v1601_v40 }
 0x403   : > { %v1641_v11 = vsel %vm1640_vm7, %v1638_v9, %v1609_v25 }
 0x404   : > { %v1644_v24 = vsel %vm1643_vm8, %v1641_v11, %v1617_v39 }
 0x41b   : > { %v1603_v50 = vpop.permute.xlu2 %1602 }
 0x423   : > { %v1627_v23 = vpop.permute.xlu2 %1626 }
 0x42f   : > { %v1579_v45 = vpop.permute.xlu0 %1578 }
 0x430   : > { %v1631_v15 = vsel %vm305_vm1, %v1559_v60, %v1579_v45 }
 0x431   : > { %v1611_v8 = vpop.permute.xlu1 %1610 }
 0x437   : > { %v1595_v14 = vpop.permute.xlu0 %1594 }
 0x439   : > { %v1625_v6 = vpop.permute.xlu1 %1624 }
 0x43a   : > { %v1647_v7 = vsel %vm1646_vm9, %v1644_v24, %v1625_v6 }
 0x43b   : > { %1649 = vst [vmem:[%s166_s16] sm:$0xff] %v1647_v7 }
 0x43f   : > { %v1587_v20 = vpop.permute.xlu0 %1586 }
 0x440   : > { %v1633_v10 = vsel %vm188_vm0, %v1631_v15, %v1587_v20 }
 0x441   : > { %v1636_v13 = vsel %vm1634_vm5, %v1633_v10, %v1595_v14 }
 0x442   : > { %v1639_v58 = vsel %vm1637_vm6, %v1636_v13, %v1603_v50 }
 0x443   : > { %v1642_v21 = vsel %vm1640_vm7, %v1639_v58, %v1611_v8 }
 0x447   : > { %v1619_v2 = vpop.permute.xlu0 %1618 }
 0x448   : > { %v1645_v48 = vsel %vm1643_vm8, %v1642_v21, %v1619_v2 }
 0x449   : > { %v1648_v42 = vsel %vm1646_vm9, %v1645_v48, %v1627_v23 }
 0x44a   : > { %1650 = vst [vmem:[%s166_s16 + $0x8] sm:$0xff] %v1648_v42 }
 0x44b PF: > { %p12_p7 = scmp.ge.s32.totalorder %s2069_s14, 4   ;;  %s2629_s9 = smov %s2013_s10 }
 0x44c   : > { %s2630_s10 = smov %s2017_s11  ;;  %s2631_s11 = smov %s2079_s17 }
 0x44d   : > { %s2632_s12 = smov %s2069_s14  ;;  %14 = sbr.rel (!%p12_p7) target bundleno = 3 (0x3), region = 68 }
 0x452   :  { %1673 = vsyncpa [#allocation3], 1 }
 0x453   :  { %1675 = vsyncpa [#allocation3 + $0x1], 1 }

</bundles_post_ra>
